<compile_context>
chip_gen: v7x
topology: tpu7x:2x2x1
jax: 0.10.0
libtpu: 0.0.40
codegen_flags: <defaults>
</compile_context>

<pallas_src>
import jax
import jax.numpy as jnp
from jax.experimental import pallas as pl
from jax.experimental.pallas import tpu as pltpu  # noqa: F401  (TPU backend)


def model_kernel(cls_ref, mask_ref, w_enc_ref, b_enc_ref, w_out_ref, b_out_ref,
                 lab_ref, prob_ref, loss_ref):
    # --- encoder stand-in, evaluated only for the CLS token ---
    e = cls_ref[...] * mask_ref[...]                                   # (B, D)
    # Single 2D MXU call (B, D) @ (D, D) instead of a batched einsum.
    h = jnp.dot(e, w_enc_ref[...], preferred_element_type=jnp.float32)
    h = jnp.tanh(h + b_enc_ref[...])                                   # (B, D)

    # --- RobertaClassificationHead: out_proj = Linear(d_model, 1) ---
    # Weight kept in its native PyTorch (1, D) lane-dense layout.  An MXU matmul
    # with N=1 wastes the array; a VPU multiply + lane reduction is cheaper.
    logits = (jnp.sum(h * w_out_ref[...], axis=-1, keepdims=True)
              + b_out_ref[...])                                        # (B, 1)

    # prob = sigmoid(logits)
    prob = jax.nn.sigmoid(logits)                                      # (B, 1)
    prob_ref[...] = prob

    # --- BCELoss(prob, labels.unsqueeze(1).float()), reduction='mean' ---
    # PyTorch BCELoss clamps each log term at -100.
    y = lab_ref[...]                                                   # (B, 1)
    log_p = jnp.maximum(jnp.log(prob), -100.0)
    log_1mp = jnp.maximum(jnp.log(1.0 - prob), -100.0)
    bce = -(y * log_p + (1.0 - y) * log_1mp)                           # (B, 1)
    loss_ref[...] = jnp.mean(bce, keepdims=True)                       # (1, 1)


def model_forward(emb, attn_masks, w_enc, b_enc, w_out, b_out, labels):
    """Returns (loss, prob) — mirrors Model.forward with labels given.

    emb:        (B, S, D) embedded tokens (encoder input)
    attn_masks: (B, S)    attention mask
    w_out:      (1, D)    out_proj weight in native nn.Linear layout
    labels:     (B, 1)    float labels (already unsqueezed)
    """
    B, S, D = emb.shape

    # The stand-in encoder is position-wise and only h[:, 0, :] is consumed, so
    # slice to the CLS slab before the kernel: only (B, D) is DMA'd to VMEM.
    cls_emb = emb[:, 0, :]            # (B, D)
    cls_mask = attn_masks[:, 0:1]     # (B, 1)

    def full(shape):
        return pl.BlockSpec(shape, lambda i, s=shape: (0,) * len(s))

    prob, loss = pl.pallas_call(
        model_kernel,
        out_shape=(jax.ShapeDtypeStruct((B, 1), jnp.float32),
                   jax.ShapeDtypeStruct((1, 1), jnp.float32)),
        grid=(1,),
        in_specs=[full((B, D)),      # CLS embeddings
                  full((B, 1)),      # CLS attention mask
                  full((D, D)),      # encoder stand-in weight
                  full((1, D)),      # encoder stand-in bias
                  full((1, D)),      # out_proj weight (nn.Linear(d_model, 1) layout)
                  full((1, 1)),      # out_proj bias
                  full((B, 1))],     # labels
        out_specs=(full((B, 1)), full((1, 1))),
        compiler_params=pltpu.CompilerParams(
            dimension_semantics=("arbitrary",)),
    )(cls_emb, cls_mask, w_enc, b_enc, w_out, b_out, labels)

    return loss[0, 0], prob


if __name__ == "__main__":
    key = jax.random.PRNGKey(0)
    B, S, D, V = 2, 8, 32, 64  # batch, seq, d_model, vocab

    k0, k1, k2, k3, k4 = jax.random.split(key, 5)

    # inputs (as in Model.forward): inputs_ids, attn_masks, labels
    input_ids = jax.random.randint(k0, (B, S), 0, V)
    attn_masks = jnp.ones((B, S), dtype=jnp.float32)
    labels = jax.random.bernoulli(k1, 0.5, (B,)).astype(jnp.float32)

    # deterministic parameter init
    emb_table = 0.02 * jax.random.normal(k2, (V, D), jnp.float32)
    w_enc = 0.05 * jax.random.normal(k3, (D, D), jnp.float32)
    b_enc = jnp.zeros((1, D), jnp.float32)
    w_out = 0.05 * jax.random.normal(k4, (1, D), jnp.float32)   # nn.Linear(d_model, 1).weight
    b_out = jnp.zeros((1, 1), jnp.float32)

    # glue: embedding lookup + label shape prep (stays in plain JAX)
    emb = jnp.take(emb_table, input_ids, axis=0)                # (B, S, D)
    labels2 = labels[:, None]                                   # (B, 1)

    loss, prob = model_forward(emb, attn_masks, w_enc, b_enc, w_out, b_out, labels2)
    jax.block_until_ready((loss, prob))
    assert prob.shape == (B, 1) and loss.shape == ()
    print("KERNEL_OK")
</pallas_src>

<mosaic_0001>
module attributes {stable_mosaic.version = 11 : i64} {
  func.func @model_kernel(%arg0: i32, %arg1: memref<2x32xf32, #tpu.memory_space<vmem>>, %arg2: memref<2x1xf32, #tpu.memory_space<vmem>>, %arg3: memref<32x32xf32, #tpu.memory_space<vmem>>, %arg4: memref<1x32xf32, #tpu.memory_space<vmem>>, %arg5: memref<1x32xf32, #tpu.memory_space<vmem>>, %arg6: memref<1x1xf32, #tpu.memory_space<vmem>>, %arg7: memref<2x1xf32, #tpu.memory_space<vmem>>, %arg8: memref<2x1xf32, #tpu.memory_space<vmem>>, %arg9: memref<1x1xf32, #tpu.memory_space<vmem>>) attributes {dimension_semantics = [#tpu.dimension_semantics<arbitrary>], iteration_bounds = array<i64: 1>, scalar_prefetch = 0 : i64, scratch_operands = 0 : i64, tpu.core_type = #tpu.core_type<tc>, window_params = [{pipeline_mode = #tpu.pipeline_mode<synchronous>, transform_indices = @transform_0, window_bounds = array<i64: 2, 32>}, {pipeline_mode = #tpu.pipeline_mode<synchronous>, transform_indices = @transform_1, window_bounds = array<i64: 2, 1>}, {pipeline_mode = #tpu.pipeline_mode<synchronous>, transform_indices = @transform_2, window_bounds = array<i64: 32, 32>}, {pipeline_mode = #tpu.pipeline_mode<synchronous>, transform_indices = @transform_3, window_bounds = array<i64: 1, 32>}, {pipeline_mode = #tpu.pipeline_mode<synchronous>, transform_indices = @transform_4, window_bounds = array<i64: 1, 32>}, {pipeline_mode = #tpu.pipeline_mode<synchronous>, transform_indices = @transform_5, window_bounds = array<i64: 1, 1>}, {pipeline_mode = #tpu.pipeline_mode<synchronous>, transform_indices = @transform_6, window_bounds = array<i64: 2, 1>}, {pipeline_mode = #tpu.pipeline_mode<synchronous>, transform_indices = @transform_7, window_bounds = array<i64: 2, 1>}, {pipeline_mode = #tpu.pipeline_mode<synchronous>, transform_indices = @transform_8, window_bounds = array<i64: 1, 1>}]} {
    %c0 = arith.constant 0 : index
    %c0_0 = arith.constant 0 : index
    %0 = vector.load %arg1[%c0, %c0_0] : memref<2x32xf32, #tpu.memory_space<vmem>>, vector<2x32xf32>
    %c0_1 = arith.constant 0 : index
    %c0_2 = arith.constant 0 : index
    %1 = vector.load %arg2[%c0_1, %c0_2] : memref<2x1xf32, #tpu.memory_space<vmem>>, vector<2x1xf32>
    %2 = vector.broadcast %1 : vector<2x1xf32> to vector<2x32xf32>
    %3 = arith.mulf %0, %2 : vector<2x32xf32>
    %c0_3 = arith.constant 0 : index
    %c0_4 = arith.constant 0 : index
    %4 = vector.load %arg3[%c0_3, %c0_4] : memref<32x32xf32, #tpu.memory_space<vmem>>, vector<32x32xf32>
    %cst = arith.constant dense<0.000000e+00> : vector<2x32xf32>
    %5 = tpu.matmul %3, %4, %cst {dimension_numbers = #tpu.dot_dimension_numbers<[1], [0], [0], [1], [0, 0, 1, 1], [], []>} : vector<2x32xf32>, vector<32x32xf32>, vector<2x32xf32> -> vector<2x32xf32>
    %c0_5 = arith.constant 0 : index
    %c0_6 = arith.constant 0 : index
    %6 = vector.load %arg4[%c0_5, %c0_6] : memref<1x32xf32, #tpu.memory_space<vmem>>, vector<1x32xf32>
    %7 = vector.broadcast %6 : vector<1x32xf32> to vector<2x32xf32>
    %8 = arith.addf %5, %7 : vector<2x32xf32>
    %9 = math.tanh %8 : vector<2x32xf32>
    %c0_7 = arith.constant 0 : index
    %c0_8 = arith.constant 0 : index
    %10 = vector.load %arg5[%c0_7, %c0_8] : memref<1x32xf32, #tpu.memory_space<vmem>>, vector<1x32xf32>
    %11 = vector.broadcast %10 : vector<1x32xf32> to vector<2x32xf32>
    %12 = arith.mulf %9, %11 : vector<2x32xf32>
    %cst_9 = arith.constant dense<0.000000e+00> : vector<2xf32>
    %13 = vector.multi_reduction <add>, %12, %cst_9 [1] : vector<2x32xf32> to vector<2xf32>
    %14 = vector.shape_cast %13 : vector<2xf32> to vector<2x1xf32>
    %c0_10 = arith.constant 0 : index
    %c0_11 = arith.constant 0 : index
    %15 = vector.load %arg6[%c0_10, %c0_11] : memref<1x1xf32, #tpu.memory_space<vmem>>, vector<1x1xf32>
    %16 = vector.broadcast %15 : vector<1x1xf32> to vector<2x1xf32>
    %17 = arith.addf %14, %16 : vector<2x1xf32>
    %18 = arith.negf %17 : vector<2x1xf32>
    %19 = math.exp %18 : vector<2x1xf32>
    %cst_12 = arith.constant 1.000000e+00 : f32
    %20 = vector.broadcast %cst_12 : f32 to vector<2x1xf32>
    %21 = arith.addf %20, %19 : vector<2x1xf32>
    %22 = arith.divf %20, %21 : vector<2x1xf32>
    %c0_13 = arith.constant 0 : index
    %c0_14 = arith.constant 0 : index
    %23 = vector.load %arg8[%c0_13, %c0_14] : memref<2x1xf32, #tpu.memory_space<vmem>>, vector<2x1xf32>
    tpu.vector_store %arg8[%c0_13, %c0_14], %22 {strides = array<i32>} : memref<2x1xf32, #tpu.memory_space<vmem>>, vector<2x1xf32>,
    %c0_15 = arith.constant 0 : index
    %c0_16 = arith.constant 0 : index
    %24 = vector.load %arg7[%c0_15, %c0_16] : memref<2x1xf32, #tpu.memory_space<vmem>>, vector<2x1xf32>
    %25 = math.log %22 : vector<2x1xf32>
    %cst_17 = arith.constant -1.000000e+02 : f32
    %26 = vector.broadcast %cst_17 : f32 to vector<2x1xf32>
    %27 = arith.maximumf %25, %26 : vector<2x1xf32>
    %cst_18 = arith.constant 1.000000e+00 : f32
    %28 = vector.broadcast %cst_18 : f32 to vector<2x1xf32>
    %29 = arith.subf %28, %22 : vector<2x1xf32>
    %30 = math.log %29 : vector<2x1xf32>
    %cst_19 = arith.constant -1.000000e+02 : f32
    %31 = vector.broadcast %cst_19 : f32 to vector<2x1xf32>
    %32 = arith.maximumf %30, %31 : vector<2x1xf32>
    %33 = arith.mulf %24, %27 : vector<2x1xf32>
    %cst_20 = arith.constant 1.000000e+00 : f32
    %34 = vector.broadcast %cst_20 : f32 to vector<2x1xf32>
    %35 = arith.subf %34, %24 : vector<2x1xf32>
    %36 = arith.mulf %35, %32 : vector<2x1xf32>
    %37 = arith.addf %33, %36 : vector<2x1xf32>
    %cst_21 = arith.constant 0.000000e+00 : f32
    %38 = vector.broadcast %cst_21 : f32 to vector<2x1xf32>
    %39 = arith.subf %38, %37 : vector<2x1xf32>
    %40 = vector.shape_cast %39 : vector<2x1xf32> to vector<1x2x1xf32>
    %cst_22 = arith.constant dense<0.000000e+00> : vector<1xf32>
    %41 = vector.multi_reduction <add>, %40, %cst_22 [1, 2] : vector<1x2x1xf32> to vector<1xf32>
    %42 = vector.shape_cast %41 : vector<1xf32> to vector<1x1x1xf32>
    %43 = vector.extract %42[0, 0, 0] : f32 from vector<1x1x1xf32>
    %44 = vector.broadcast %43 : f32 to vector<1x1xf32>
    %cst_23 = arith.constant 2.000000e+00 : f32
    %45 = vector.broadcast %cst_23 : f32 to vector<1x1xf32>
    %46 = arith.divf %44, %45 : vector<1x1xf32>
    %c0_24 = arith.constant 0 : index
    %c0_25 = arith.constant 0 : index
    %47 = vector.load %arg9[%c0_24, %c0_25] : memref<1x1xf32, #tpu.memory_space<vmem>>, vector<1x1xf32>
    tpu.vector_store %arg9[%c0_24, %c0_25], %46 {strides = array<i32>} : memref<1x1xf32, #tpu.memory_space<vmem>>, vector<1x1xf32>,
    return
  }
  func.func @transform_0(%arg0: i32) -> (i32, i32) {
    %c0_i32 = arith.constant 0 : i32
    %c0_i32_0 = arith.constant 0 : i32
    %c0_i32_1 = arith.constant 0 : i32
    return %c0_i32, %c0_i32_0 : i32, i32
  }
  func.func @transform_1(%arg0: i32) -> (i32, i32) {
    %c0_i32 = arith.constant 0 : i32
    %c0_i32_0 = arith.constant 0 : i32
    %c0_i32_1 = arith.constant 0 : i32
    return %c0_i32, %c0_i32_0 : i32, i32
  }
  func.func @transform_2(%arg0: i32) -> (i32, i32) {
    %c0_i32 = arith.constant 0 : i32
    %c0_i32_0 = arith.constant 0 : i32
    %c0_i32_1 = arith.constant 0 : i32
    return %c0_i32, %c0_i32_0 : i32, i32
  }
  func.func @transform_3(%arg0: i32) -> (i32, i32) {
    %c0_i32 = arith.constant 0 : i32
    %c0_i32_0 = arith.constant 0 : i32
    %c0_i32_1 = arith.constant 0 : i32
    return %c0_i32, %c0_i32_0 : i32, i32
  }
  func.func @transform_4(%arg0: i32) -> (i32, i32) {
    %c0_i32 = arith.constant 0 : i32
    %c0_i32_0 = arith.constant 0 : i32
    %c0_i32_1 = arith.constant 0 : i32
    return %c0_i32, %c0_i32_0 : i32, i32
  }
  func.func @transform_5(%arg0: i32) -> (i32, i32) {
    %c0_i32 = arith.constant 0 : i32
    %c0_i32_0 = arith.constant 0 : i32
    %c0_i32_1 = arith.constant 0 : i32
    return %c0_i32, %c0_i32_0 : i32, i32
  }
  func.func @transform_6(%arg0: i32) -> (i32, i32) {
    %c0_i32 = arith.constant 0 : i32
    %c0_i32_0 = arith.constant 0 : i32
    %c0_i32_1 = arith.constant 0 : i32
    return %c0_i32, %c0_i32_0 : i32, i32
  }
  func.func @transform_7(%arg0: i32) -> (i32, i32) {
    %c0_i32 = arith.constant 0 : i32
    %c0_i32_0 = arith.constant 0 : i32
    %c0_i32_1 = arith.constant 0 : i32
    return %c0_i32, %c0_i32_0 : i32, i32
  }
  func.func @transform_8(%arg0: i32) -> (i32, i32) {
    %c0_i32 = arith.constant 0 : i32
    %c0_i32_0 = arith.constant 0 : i32
    %c0_i32_1 = arith.constant 0 : i32
    return %c0_i32, %c0_i32_0 : i32, i32
  }
}

</mosaic_0001>

<bundles_post_ra>
// kernel: tpu_custom_call.1
= control target key start
LH: loop header
LB: loop body
LE: loop exit
PB: predicated region body
PF: predicated region fallthrough
CT: control target
= control target key end

     0   :  { %s410_s0 = inlined_call_operand.vmem [shape: f32[2,32], index: 0, kind: input, shape index: {}]   ;;  %s411_s1 = inlined_call_operand.vmem [shape: f32[2,1], index: 1, kind: input, shape index: {}]   ;;  %s412_s2 = inlined_call_operand.hbm [shape: f32[32,32], index: 2, kind: input, shape index: {}]   ;;  %s413_s3 = inlined_call_operand.vmem [shape: f32[1,32], index: 3, kind: input, shape index: {}]   ;;  %s414_s4 = inlined_call_operand.vmem [shape: f32[1,32], index: 4, kind: input, shape index: {}]   ;;  %s415_s5 = inlined_call_operand.<no memory space> [shape: f32[1,1], index: 5, kind: input, shape index: {}]   ;;  %s416_s6 = inlined_call_operand.vmem [shape: f32[2,1], index: 6, kind: input, shape index: {}]   ;;  %s417_s7 = inlined_call_operand.vmem [shape: f32[2,1], index: 7, kind: output, shape index: {0}]   ;;  %s418_s8 = inlined_call_operand.hbm [shape: f32[1,1], index: 8, kind: output, shape index: {1}]  }
   0x1   :  { %v14_v0 = vstv %s415_s5 }
   0x2   :  { %15 = vst [vmem:[#allocation2] sm:$0x1] %v14_v0 }
   0x3   :  { %16 = vsyncpa [#allocation4], 0 }
   0x4   :  { %17 = vsyncpa [#allocation5], 0  ;;  %s310_s29 = smov [#allocation3]   ;;  %s262_s11 = scalar_lea.hbm %s412_s2, 512 }
   0x5   :  { %s27_s30 = sshll.u32 %s310_s29, 4  ;;  %p263_p0 = scmp.ne.s32.totalorder %s412_s2, %s262_s11  ;;  %s28_s30 = int_to_ptr.vmem [resolvable:$true] %s27_s30 }
   0x6   :  { %p266_p1 = scmp.lt.u32.totalorder %s262_s11, %s412_s2 }
   0x8   :  { %p268_p2 = pnand %p266_p1, %p263_p0 }
   0xa   :  { %271 = shalt.err (!%p268_p2)
}
   0xb   :  { %s272_s5 = scalar_lea.vmem %s28_s30, 512  ;;  %p277_p4 = scmp.lt.s32.totalorder %s28_s30, %s28_s30 }
   0xc   :  { %p273_p3 = scmp.ne.s32.totalorder %s28_s30, %s272_s5  ;;  %p278_p5 = scmp.lt.s32.totalorder %s272_s5, %s272_s5 }
   0xe   :  { %p279_p6 = por %p278_p5, %p277_p4 }
  0x10   :  { %p280_p7 = pnand %p279_p6, %p273_p3 }
  0x12   :  { %283 = shalt.err (!%p280_p7)
}
  0x13   :  { %s311_s16 = smov 128   ;;  %s312_s17 = smov 8  }
  0x14   :  { %33 = dma.hbm_to_vmem [thread:$0]  %s412_s2, 512, %s28_s30, [#allocation4], %s311_s16, %s311_s16, %s312_s17  }
  0x15   :  { %306 = dma.done.wait [#allocation4], 512  }
  0x16   :  { %307 = vsyncadd [#allocation4], 4294966784  ;;  %v313_v1 = vmov 0   ;;  %v314_v2 = vmov 0.0|0.0   ;;  %v46_v3 = vld [vmem:[%s411_s1] sm:$0x3] }
  0x17   :  { %251 = vset.pattern.permute.xlu0 %v313_v1  ;;  %235 = vmatprep.subr.bf16.mxu0 %v314_v2  ;;  %v53_v4 = vld [vmem:[#allocation3] sm:$0xff]  ;;  %v54_v5 = vld [vmem:[#allocation3 + $0x8] sm:$0xff]  ;;  %v55_v7 = vld [vmem:[#allocation3 + $0x10] sm:$0xff]  ;;  %vm315_vm0 = vmmov 0   ;;  %v316_v9 = vmov 0.0   ;;  %vm64_vm1 = vcmask 261120  }
  0x18   :  { %49 = vperm.xlu0 %251, %v46_v3   ;;  %v236_v6 = vpack.c.bf16 %v54_v5, %v53_v4  ;;  %v56_v8 = vld [vmem:[#allocation3 + $0x18] sm:$0xff]  ;;  %232 = vmatprep.mubr.msk.f32.mxu0 %vm315_vm0, %v316_v9  ;;  %vm147_vm2 = vcmask 254976   ;;  %vm165_vm3 = vcmask 1024   ;;  %vm193_vm4 = vcmask 0  }
  0x19   :  { %v239_v10 = vpack.c.bf16 %v56_v8, %v55_v7  ;;  %v45_v11 = vld [vmem:[%s410_s0] sm:$0x3] }
  0x1a   :  { %237 = vmatpush3.bf16.msra.mxu0 %v236_v6  ;;  %v214_v14 = vld [vmem:[%s413_s3] ss:$0 sm:$0xff] }
  0x1b   :  { %238 = vmatprep.subr.bf16.mxu0 %v314_v2  ;;  %v216_v18 = vld [vmem:[%s414_s4] ss:$0 sm:$0xff] }
  0x1c   :  { %v217_v22 = vld [vmem:[#allocation2] ss:$0 sm:$0xff] }
  0x1d   :  { %v167_v31 = vld [vmem:[%s416_s6] sm:$0x3]  ;;  %s317_s6 = smov [#allocation6]  }
  0x1e   :  { %240 = vmatpush3.bf16.msra.mxu0 %v239_v10  ;;  %v176_v36 = vsub.f32 1.0, %v167_v31 }
  0x97   :  { %v50_v12 = vpop.permute.xlu0 %49 }
  0x98   :  { %v52_v13 = vmul.f32 %v50_v12, %v45_v11 }
  0x9a   :  { %233 = vmatmul.mubr.msk.f32.vlgmr.msra.gmra.mrb[0].mxu0 %vm64_vm1, %v52_v13 }
 0x16d   :  { %v134_v15 = vpop.f32.mrb[0].mxu0 }
 0x16e   :  { %v135_v16 = vadd.f32 %v214_v14, %v134_v15  ;;  %v234_v17 = vpop.f32.mrb[1].mxu0 }
 0x170   :  { %252 = vtanh.f32 %v135_v16 }
 0x17a   :  { %v253_v19 = vpop.eup %252 }
 0x17b   :  { %v146_v20 = vmul.f32 %v253_v19, %v216_v18 }
 0x17d   :  { %v148_v21 = vsel %vm147_vm2, %v146_v20, 0.0 }
 0x17e   :  { %149 = vadd.xlane.f32.xlu0 %v148_v21 }
 0x20b   :  { %v150_v23 = vpop.xlane.xlu0 %149 }
 0x20c   :  { %v158_v24 = vadd.f32 %v217_v22, %v150_v23 }
 0x20e   :  { %v218_v25 = vmul.f32 -1.442695, %v158_v24 }
 0x210   :  { %254 = vpow2.f32 %v218_v25 }
 0x21a   :  { %v255_v26 = vpop.eup %254 }
 0x21b   :  { %v162_v27 = vadd.f32 1.0, %v255_v26 }
 0x21d   :  { %256 = vrcp.f32 %v162_v27 }
 0x227   :  { %v257_v28 = vpop.eup %256 }
 0x228   :  { %258 = vlog2.f32 %v257_v28  ;;  %v171_v29 = vsub.f32 1.0, %v257_v28  ;;  %166 = vst.msk [vmem:[%s417_s7] sm:$0x3] %vm165_vm3, %v257_v28  ;;  %s203_s7 = sshll.u32 %s317_s6, 4  ;;  %s204_s7 = int_to_ptr.vmem [resolvable:$true] %s203_s7 }
 0x229   :  { %s284_s28 = scalar_lea.vmem %s204_s7, 16  ;;  %s288_s29 = scalar_lea.vmem %s204_s7, 32 }
 0x22a   :  { %260 = vlog2.f32 %v171_v29  ;;  %p285_p8 = scmp.ne.s32.totalorder %s204_s7, %s284_s28  ;;  %p289_p9 = scmp.lt.s32.totalorder %s204_s7, %s204_s7 }
 0x22b   :  { %p290_p10 = scmp.lt.s32.totalorder %s288_s29, %s284_s28 }
 0x22d   :  { %p291_p11 = por %p290_p10, %p289_p9 }
 0x22f   :  { %p292_p12 = pnand %p291_p11, %p285_p8 }
 0x232   :  { %v259_v30 = vpop.eup %258 }
 0x233   :  { %v169_v32 = vmul.f32 0.6931472, %v259_v30 }
 0x234   :  { %v261_v33 = vpop.eup %260 }
 0x235   :  { %v170_v34 = vmax.f32 %v169_v32, -100.0  ;;  %v173_v35 = vmul.f32 0.6931472, %v261_v33 }
 0x237   :  { %v174_v37 = vmax.f32 %v173_v35, -100.0  ;;  %v175_v38 = vmul.f32 %v170_v34, %v167_v31 }
 0x239   :  { %v177_v39 = vmul.f32 %v176_v36, %v174_v37 }
 0x23b   :  { %v178_v40 = vadd.f32 %v177_v39, %v175_v38 }
 0x23d   :  { %v179_v41 = vsub.f32 0.0, %v178_v40 }
 0x23f   :  { %v180_v42 = vsel %vm165_vm3, %v179_v41, 0.0 }
 0x240   :  { %181 = vadd.xlane.f32.xlu1 %v180_v42 }
 0x2cd   :  { %v182_v43 = vpop.xlane.xlu1 %181 }
 0x2ce   :  { %v183_v44 = vrot.slane %v182_v43, 4 }
 0x2d0   :  { %v184_v45 = vadd.f32 %v183_v44, %v182_v43 }
 0x2d2   :  { %v185_v46 = vrot.slane %v184_v45, 2 }
 0x2d4   :  { %v186_v47 = vadd.f32 %v185_v46, %v184_v45 }
 0x2d6   :  { %v187_v48 = vrot.slane %v186_v47, 1 }
 0x2d8   :  { %v188_v49 = vadd.f32 %v187_v48, %v186_v47 }
 0x2da   :  { %241 = vpush %v188_v49 }
 0x30b   :  { %s242_s27 = spop %241 }
 0x30c   :  { %v190_v50 = vstv %s242_s27 }
 0x30d   :  { %v192_v51 = vmul.f32 0.5, %v190_v50 }
 0x30f   :  { %194 = vst.msk [vmem:[#allocation6] sm:$0x1] %vm193_vm4, %v192_v51 }
 0x310   :  { %295 = shalt.err (!%p292_p12)
}
 0x311   :  { %s296_s10 = scalar_lea.hbm %s418_s8, 16 }
 0x312   :  { %p297_p13 = scmp.ne.s32.totalorder %s418_s8, %s296_s10  ;;  %p300_p0 = scmp.lt.u32.totalorder %s296_s10, %s418_s8 }
 0x314   :  { %p302_p1 = pnand %p300_p0, %p297_p13 }
 0x316   :  { %305 = shalt.err (!%p302_p1)
}
 0x317   :  { %206 = dma.vmem_to_hbm [thread:$0]  %s204_s7, 16, %s418_s8, [#allocation5]  }
 0x318   :  { %308 = dma.done.wait [#allocation5], 16  }
 0x319   :  { %309 = vsyncadd [#allocation5], 4294967280 }
 0x31a   :  { %212 = vsyncpa [#allocation4], 1 }
 0x31b   :  { %213 = vsyncpa [#allocation5], 1 }

</bundles_post_ra>
